<compile_context>
chip_gen: v6e
topology: v6e:2x2x1
jax: 0.10.0
libtpu: 0.0.40
codegen_flags: <defaults>
</compile_context>

<pallas_src>
import jax
import jax.numpy as jnp
from jax.experimental import pallas as pl
from jax.experimental.pallas import tpu as pltpu


# ----------------------------------------------------------------------------
# Generation-aware VMEM budgeting
# ----------------------------------------------------------------------------
def _round_up(x, m):
    return ((x + m - 1) // m) * m


def _vmem_budgets():
    """Returns (planning_budget, vmem_limit_bytes) for the current TPU gen."""
    cap = None
    try:
        info = pltpu.get_tpu_info()
        cap = int(getattr(info, "vmem_capacity_bytes", 0)) or None
    except Exception:
        cap = None
    if cap is None:
        cap = 64 * 1024 * 1024  # conservative fallback: v7x per-TC VMEM
    # Plan tile sizes at ~60% of physical VMEM; let Mosaic use up to ~85%
    # (headroom for the approximate accounting in _step_bytes).
    return int(cap * 0.60), int(cap * 0.85)


def _compiler_params(semantics, vmem_limit):
    return pltpu.CompilerParams(dimension_semantics=semantics,
                                vmem_limit_bytes=int(vmem_limit))


def _step_bytes(c_rows, hw, isz):
    """Approx per-grid-step VMEM footprint for a (1, c_rows, hw) x/y block."""
    chunk = min(hw, max(128, _round_up(-(-hw // 8), 128)))
    payload = c_rows * hw * isz * 5          # 2x in + 2x out (double-buffered) + working copy
    f32_tmp = c_rows * chunk * 4 * 2         # chunked f32 cast + square temporaries
    small = 6 * _round_up(max(c_rows, 8), 8) * 128 * 4   # padded (C,1)-style param blocks
    return int((payload + f32_tmp + small) * 1.25)       # ~25% safety margin


def _single_pass_fits(C, HW, isz, budget):
    return _step_bytes(C, HW, isz) <= budget


def _pick_c_tile(C, HW, isz, budget):
    """Largest channel tile (multiple of the sublane packing) that fits."""
    align = 8 if isz >= 4 else 16
    if C <= align:
        return C
    best = None
    ct = align
    while ct <= C:
        if C % ct == 0 and _step_bytes(ct, HW, isz) <= budget:
            best = ct
        ct += align
    if best is not None:
        return best
    # No fitting divisor: largest fitting multiple of `align`; the grid's cdiv
    # handles the partial last channel block.
    ct = (C // align) * align
    while ct > align and _step_bytes(ct, HW, isz) > budget:
        ct -= align
    return max(ct, align)   # best effort; vmem_limit keeps headroom above plan


# ----------------------------------------------------------------------------
# In-kernel helpers
# ----------------------------------------------------------------------------
def _chunked_ssq(x_ref, max_chunks=8):
    """Per-channel sum of squares over the spatial (lane) axis, f32 accum.

    Slices the ref into <= max_chunks static lane chunks so only one chunk is
    cast to f32 at a time (bounds the f32 temporary to ~block/8 instead of a
    full f32 copy of the block).
    """
    _, c, hw = x_ref.shape
    chunk = min(hw, max(128, _round_up(-(-hw // max_chunks), 128)))
    ssq = jnp.zeros((1, c, 1), jnp.float32)
    start = 0
    while start < hw:
        size = min(chunk, hw - start)
        xb = x_ref[:, :, start:start + size].astype(jnp.float32)
        ssq = ssq + jnp.sum(xb * xb, axis=-1, keepdims=True)
        start += size
    return ssq


# ----------------------------------------------------------------------------
# Path A: single pass — one grid step per batch element, full (C, HW) slab
# ----------------------------------------------------------------------------
def _grn_single_pass_kernel(eps):
    def kernel(x_ref, gamma_ref, beta_ref, o_ref):
        ssq = _chunked_ssq(x_ref)                              # (1, C, 1) f32
        gx = jnp.sqrt(ssq)                                     # (1, C, 1)
        mean_gx = jnp.mean(gx, axis=1, keepdims=True)          # (1, 1, 1)
        nx = gx / (mean_gx + eps)                              # (1, C, 1)
        gamma = gamma_ref[...].astype(jnp.float32)[None]       # (1, C, 1)
        # Fold gamma*nx into a single per-channel scale; run the streaming
        # elementwise in the input dtype (bf16-native VPU on v6e/v7x).
        scale = (gamma * nx + 1.0).astype(x_ref.dtype)         # (1, C, 1)
        bias = beta_ref[...].astype(x_ref.dtype)[None]         # (1, C, 1)
        o_ref[...] = (x_ref[...] * scale + bias).astype(o_ref.dtype)
    return kernel


def _grn_single_pass_call(x_l, gamma2, beta2, eps, vmem_limit):
    B, C, HW = x_l.shape
    return pl.pallas_call(
        _grn_single_pass_kernel(eps),
        out_shape=jax.ShapeDtypeStruct((B, C, HW), x_l.dtype),
        grid_spec=pltpu.PrefetchScalarGridSpec(
            num_scalar_prefetch=0,
            grid=(B,),
            in_specs=[
                pl.BlockSpec((1, C, HW), lambda b: (b, 0, 0)),
                pl.BlockSpec((C, 1), lambda b: (0, 0)),
                pl.BlockSpec((C, 1), lambda b: (0, 0)),
            ],
            out_specs=pl.BlockSpec((1, C, HW), lambda b: (b, 0, 0)),
        ),
        # NOTE: grid=(B,) -> batch-1 runs on one TensorCore on v7x; large
        # batch-1 slabs take the channel-tiled path, which is megacore-friendly.
        compiler_params=_compiler_params(("parallel",), vmem_limit),
    )(x_l, gamma2, beta2)


# ----------------------------------------------------------------------------
# Path B: channel(sublane)-tiled two-kernel pipeline (full HW on lanes)
# ----------------------------------------------------------------------------
def _grn_ssq_kernel(x_ref, ssq_ref):
    ssq_ref[...] = _chunked_ssq(x_ref)


def _grn_ssq_call(x_l, c_tile, vmem_limit):
    B, C, HW = x_l.shape
    CT = -(-C // c_tile)
    return pl.pallas_call(
        _grn_ssq_kernel,
        out_shape=jax.ShapeDtypeStruct((B, C, 1), jnp.float32),
        grid_spec=pltpu.PrefetchScalarGridSpec(
            num_scalar_prefetch=0,
            grid=(B, CT),
            in_specs=[pl.BlockSpec((1, c_tile, HW), lambda b, ct: (b, ct, 0))],
            out_specs=pl.BlockSpec((1, c_tile, 1), lambda b, ct: (b, ct, 0)),
        ),
        compiler_params=_compiler_params(("parallel", "parallel"), vmem_limit),
    )(x_l)


def _grn_apply_kernel(x_ref, scale_ref, beta_ref, o_ref):
    x = x_ref[...]
    scale = scale_ref[...].astype(x.dtype)          # (1, Ct, 1)
    bias = beta_ref[...].astype(x.dtype)[None]      # (1, Ct, 1)
    o_ref[...] = (x * scale + bias).astype(o_ref.dtype)


def _grn_apply_call(x_l, scale, beta2, c_tile, vmem_limit):
    B, C, HW = x_l.shape
    CT = -(-C // c_tile)
    # TODO(synk): sweep pipeline_mode=pl.Buffered(3) on the x BlockSpec when
    # VMEM headroom allows (this streaming phase is DMA-bound).
    return pl.pallas_call(
        _grn_apply_kernel,
        out_shape=jax.ShapeDtypeStruct((B, C, HW), x_l.dtype),
        grid_spec=pltpu.PrefetchScalarGridSpec(
            num_scalar_prefetch=0,
            grid=(B, CT),
            in_specs=[
                pl.BlockSpec((1, c_tile, HW), lambda b, ct: (b, ct, 0)),
                pl.BlockSpec((1, c_tile, 1), lambda b, ct: (b, ct, 0)),
                pl.BlockSpec((c_tile, 1), lambda b, ct: (ct, 0)),
            ],
            out_specs=pl.BlockSpec((1, c_tile, HW), lambda b, ct: (b, ct, 0)),
        ),
        compiler_params=_compiler_params(("parallel", "parallel"), vmem_limit),
    )(x_l, scale, beta2)


# ----------------------------------------------------------------------------
# Wrapper / path selection
# ----------------------------------------------------------------------------
def grn_channel_first(x, gamma, beta, eps=1e-6, *, force_tiled=False, c_tile=None):
    """GRN forward, data_format='channel_first'. x: (B,C,H,W); gamma,beta: (C,)."""
    # TODO(synk): data_format='channel_last' variant (module default is channel_first).
    B, C, H, W = x.shape
    HW = H * W
    x_l = x.reshape(B, C, HW)            # free reshape, channel-first layout kept
    gamma2 = gamma.reshape(C, 1)
    beta2 = beta.reshape(C, 1)
    isz = x.dtype.itemsize

    plan_budget, vmem_limit = _vmem_budgets()

    if not force_tiled and _single_pass_fits(C, HW, isz, plan_budget):
        out = _grn_single_pass_call(x_l, gamma2, beta2, eps, vmem_limit)
    else:
        ct = c_tile if c_tile is not None else _pick_c_tile(C, HW, isz, plan_budget)
        ct = max(1, min(ct, C))
        ssq = _grn_ssq_call(x_l, ct, vmem_limit)                     # (B, C, 1) f32
        gx = jnp.sqrt(ssq)
        nx = gx / (jnp.mean(gx, axis=1, keepdims=True) + eps)        # (B, C, 1)
        scale = gamma.reshape(1, C, 1).astype(jnp.float32) * nx + 1.0
        out = _grn_apply_call(x_l, scale, beta2, ct, vmem_limit)

    return out.reshape(B, C, H, W)


def grn_reference(x, gamma, beta, eps=1e-6):
    """Pure-JAX reference matching the PyTorch channel_first branch."""
    x32 = x.astype(jnp.float32)
    gx = jnp.sqrt(jnp.sum(x32 * x32, axis=(2, 3), keepdims=True))
    nx = gx / (jnp.mean(gx, axis=1, keepdims=True) + eps)
    g = gamma.reshape(1, -1, 1, 1).astype(jnp.float32)
    b = beta.reshape(1, -1, 1, 1).astype(jnp.float32)
    return (g * (x32 * nx) + b + x32).astype(x.dtype)


if __name__ == "__main__":
    key = jax.random.PRNGKey(0)
    keys = jax.random.split(key, 9)

    # --- Small f32 shape: exercises the single-pass path. ---
    B, C, H, W = 2, 4, 16, 16
    x = jax.random.normal(keys[0], (B, C, H, W), dtype=jnp.float32)
    # Module __init__ zero-inits gamma/beta; use non-zero values so the affine
    # path is actually exercised.
    gamma = jax.random.normal(keys[1], (C,), dtype=jnp.float32) * 0.1
    beta = jax.random.normal(keys[2], (C,), dtype=jnp.float32) * 0.1

    y = jax.block_until_ready(grn_channel_first(x, gamma, beta, eps=1e-6))
    y_ref = grn_reference(x, gamma, beta, eps=1e-6)
    assert y.shape == (B, C, H, W)
    assert jnp.allclose(y, y_ref, atol=1e-5, rtol=1e-5), "single-pass mismatch"

    # --- Force the channel-tiled path (batch 1, C tiled at 8; HW=400 shows
    #     there is no 128-divisibility constraint with C-tiling). ---
    B2, C2, H2, W2 = 1, 16, 20, 20
    x2 = jax.random.normal(keys[3], (B2, C2, H2, W2), dtype=jnp.float32)
    g2 = jax.random.normal(keys[4], (C2,), dtype=jnp.float32) * 0.1
    b2 = jax.random.normal(keys[5], (C2,), dtype=jnp.float32) * 0.1

    y2 = jax.block_until_ready(
        grn_channel_first(x2, g2, b2, eps=1e-6, force_tiled=True, c_tile=8))
    y2_ref = grn_reference(x2, g2, b2, eps=1e-6)
    assert y2.shape == (B2, C2, H2, W2)
    assert jnp.allclose(y2, y2_ref, atol=1e-5, rtol=1e-5), "tiled-path mismatch"

    # --- bf16 input: exercises the bf16 (input-dtype) elementwise store path. ---
    x3 = jax.random.normal(keys[6], (B, C, H, W), dtype=jnp.float32).astype(jnp.bfloat16)
    g3 = jax.random.normal(keys[7], (C,), dtype=jnp.float32) * 0.1
    b3 = jax.random.normal(keys[8], (C,), dtype=jnp.float32) * 0.1

    y3 = jax.block_until_ready(grn_channel_first(x3, g3, b3, eps=1e-6))
    y3_ref = grn_reference(x3, g3, b3, eps=1e-6)
    assert y3.shape == (B, C, H, W)
    assert jnp.allclose(y3.astype(jnp.float32), y3_ref.astype(jnp.float32),
                        atol=5e-2, rtol=5e-2), "bf16 mismatch"

    print("KERNEL_OK")
</pallas_src>

<mosaic_0001>
module attributes {stable_mosaic.version = 11 : i64} {
  func.func @kernel(%arg0: i32, %arg1: memref<1x4x256xf32, #tpu.memory_space<vmem>>, %arg2: memref<4x1xf32, #tpu.memory_space<vmem>>, %arg3: memref<4x1xf32, #tpu.memory_space<vmem>>, %arg4: memref<1x4x256xf32, #tpu.memory_space<vmem>>) attributes {dimension_semantics = [#tpu.dimension_semantics<parallel>], iteration_bounds = array<i64: 2>, scalar_prefetch = 0 : i64, scratch_operands = 0 : i64, tpu.core_type = #tpu.core_type<tc>, window_params = [{transform_indices = @transform_0, window_bounds = array<i64: 1, 4, 256>}, {pipeline_mode = #tpu.pipeline_mode<synchronous>, transform_indices = @transform_1, window_bounds = array<i64: 4, 1>}, {pipeline_mode = #tpu.pipeline_mode<synchronous>, transform_indices = @transform_2, window_bounds = array<i64: 4, 1>}, {transform_indices = @transform_3, window_bounds = array<i64: 1, 4, 256>}]} {
    %cst = arith.constant 0.000000e+00 : f32
    %0 = vector.broadcast %cst : f32 to vector<1x4x1xf32>
    %c0 = arith.constant 0 : index
    %c0_0 = arith.constant 0 : index
    %c0_1 = arith.constant 0 : index
    %1 = vector.load %arg1[%c0, %c0_0, %c0_1] : memref<1x4x256xf32, #tpu.memory_space<vmem>>, vector<1x4x128xf32>
    %2 = arith.mulf %1, %1 : vector<1x4x128xf32>
    %cst_2 = arith.constant dense<0.000000e+00> : vector<1x4xf32>
    %3 = vector.multi_reduction <add>, %2, %cst_2 [2] : vector<1x4x128xf32> to vector<1x4xf32>
    %4 = vector.shape_cast %3 : vector<1x4xf32> to vector<1x4x1xf32>
    %5 = arith.addf %0, %4 : vector<1x4x1xf32>
    %c0_3 = arith.constant 0 : index
    %c0_4 = arith.constant 0 : index
    %c128 = arith.constant 128 : index
    %6 = vector.load %arg1[%c0_3, %c0_4, %c128] : memref<1x4x256xf32, #tpu.memory_space<vmem>>, vector<1x4x128xf32>
    %7 = arith.mulf %6, %6 : vector<1x4x128xf32>
    %cst_5 = arith.constant dense<0.000000e+00> : vector<1x4xf32>
    %8 = vector.multi_reduction <add>, %7, %cst_5 [2] : vector<1x4x128xf32> to vector<1x4xf32>
    %9 = vector.shape_cast %8 : vector<1x4xf32> to vector<1x4x1xf32>
    %10 = arith.addf %5, %9 : vector<1x4x1xf32>
    %11 = math.sqrt %10 : vector<1x4x1xf32>
    %cst_6 = arith.constant dense<0.000000e+00> : vector<1x1xf32>
    %12 = vector.multi_reduction <add>, %11, %cst_6 [1] : vector<1x4x1xf32> to vector<1x1xf32>
    %13 = vector.shape_cast %12 : vector<1x1xf32> to vector<1x1x1xf32>
    %cst_7 = arith.constant 4.000000e+00 : f32
    %14 = vector.broadcast %cst_7 : f32 to vector<1x1x1xf32>
    %15 = arith.divf %13, %14 : vector<1x1x1xf32>
    %cst_8 = arith.constant 9.99999997E-7 : f32
    %16 = vector.broadcast %cst_8 : f32 to vector<1x1x1xf32>
    %17 = arith.addf %15, %16 : vector<1x1x1xf32>
    %18 = vector.broadcast %17 : vector<1x1x1xf32> to vector<1x4x1xf32>
    %19 = arith.divf %11, %18 : vector<1x4x1xf32>
    %c0_9 = arith.constant 0 : index
    %c0_10 = arith.constant 0 : index
    %20 = vector.load %arg2[%c0_9, %c0_10] : memref<4x1xf32, #tpu.memory_space<vmem>>, vector<4x1xf32>
    %21 = vector.shape_cast %20 : vector<4x1xf32> to vector<1x4x1xf32>
    %22 = arith.mulf %21, %19 : vector<1x4x1xf32>
    %cst_11 = arith.constant 1.000000e+00 : f32
    %23 = vector.broadcast %cst_11 : f32 to vector<1x4x1xf32>
    %24 = arith.addf %22, %23 : vector<1x4x1xf32>
    %c0_12 = arith.constant 0 : index
    %c0_13 = arith.constant 0 : index
    %25 = vector.load %arg3[%c0_12, %c0_13] : memref<4x1xf32, #tpu.memory_space<vmem>>, vector<4x1xf32>
    %26 = vector.shape_cast %25 : vector<4x1xf32> to vector<1x4x1xf32>
    %c0_14 = arith.constant 0 : index
    %c0_15 = arith.constant 0 : index
    %c0_16 = arith.constant 0 : index
    %27 = vector.load %arg1[%c0_14, %c0_15, %c0_16] : memref<1x4x256xf32, #tpu.memory_space<vmem>>, vector<1x4x256xf32>
    %28 = vector.broadcast %24 : vector<1x4x1xf32> to vector<1x4x256xf32>
    %29 = arith.mulf %27, %28 : vector<1x4x256xf32>
    %30 = vector.broadcast %26 : vector<1x4x1xf32> to vector<1x4x256xf32>
    %31 = arith.addf %29, %30 : vector<1x4x256xf32>
    %c0_17 = arith.constant 0 : index
    %c0_18 = arith.constant 0 : index
    %c0_19 = arith.constant 0 : index
    %32 = vector.load %arg4[%c0_17, %c0_18, %c0_19] : memref<1x4x256xf32, #tpu.memory_space<vmem>>, vector<1x4x256xf32>
    tpu.vector_store %arg4[%c0_17, %c0_18, %c0_19], %31 {strides = array<i32>} : memref<1x4x256xf32, #tpu.memory_space<vmem>>, vector<1x4x256xf32>,
    return
  }
  func.func @transform_0(%arg0: i32) -> (i32, i32, i32) {
    %c0_i32 = arith.constant 0 : i32
    %c0_i32_0 = arith.constant 0 : i32
    %c0_i32_1 = arith.constant 0 : i32
    return %arg0, %c0_i32, %c0_i32_0 : i32, i32, i32
  }
  func.func @transform_1(%arg0: i32) -> (i32, i32) {
    %c0_i32 = arith.constant 0 : i32
    %c0_i32_0 = arith.constant 0 : i32
    %c0_i32_1 = arith.constant 0 : i32
    return %c0_i32, %c0_i32_0 : i32, i32
  }
  func.func @transform_2(%arg0: i32) -> (i32, i32) {
    %c0_i32 = arith.constant 0 : i32
    %c0_i32_0 = arith.constant 0 : i32
    %c0_i32_1 = arith.constant 0 : i32
    return %c0_i32, %c0_i32_0 : i32, i32
  }
  func.func @transform_3(%arg0: i32) -> (i32, i32, i32) {
    %c0_i32 = arith.constant 0 : i32
    %c0_i32_0 = arith.constant 0 : i32
    %c0_i32_1 = arith.constant 0 : i32
    return %arg0, %c0_i32, %c0_i32_0 : i32, i32, i32
  }
}

</mosaic_0001>

<bundles_post_ra>
// kernel: tpu_custom_call.1
= control target key start
LH: loop header
LB: loop body
LE: loop exit
PB: predicated region body
PF: predicated region fallthrough
CT: control target
= control target key end

     0   :  { %8 = vsyncpa [#allocation3], 0  ;;  %s683_s0 = inlined_call_operand.hbm [shape: f32[2,4,256], index: 0, kind: input, shape index: {}]   ;;  %s684_s1 = inlined_call_operand.vmem [shape: f32[4,1], index: 1, kind: input, shape index: {}]   ;;  %s685_s2 = inlined_call_operand.vmem [shape: f32[4,1], index: 2, kind: input, shape index: {}]   ;;  %s686_s3 = inlined_call_operand.hbm [shape: f32[2,4,256], index: 3, kind: output, shape index: {}]  }
   0x1   :  { %10 = vsyncpa [#allocation3 + $0x1], 0 }
   0x2   :  { %11 = vsyncpa [#allocation4], 0 }
   0x3   :  { %13 = vsyncpa [#allocation4 + $0x1], 0  ;;  %s524_s12 = smov 0   ;;  %s526_s13 = smov 0  }
   0x4   :  { %s528_s14 = smov 0   ;;  %s530_s15 = smov 0  }
   0x5 LB: > { %s545_s16 = sadd.s32 4294967295, %s498_s15   ;;  %s336_s17 = sadd.s32 4294967294, %s498_s15   ;;  %s498_s15 = sphi %s530_s15, %s703_s15   ;;  %s494_s14 = sphi %s528_s14, %s702_s14   ;;  %s490_s13 = sphi %s526_s13, %s701_s13   ;;  %s486_s12 = sphi %s524_s12, %s700_s12  }
   0x6   : > { %s549_s18 = sadd.s32 1, %s498_s15   ;;  %s26_s19 = sadd.s32 1, %s494_s14 }
   0x7   : > { %s23_s20 = ssub.s32 %s498_s15, %s549_s18  ;;  %p33_p0 = scmp.ne.s32.totalorder %s494_s14, %s490_s13 }
   0x8   : > { %p24_p1 = scmp.eq.s32.totalorder %s23_s20, 0  ;;  %p34_p2 = scmp.eq.s32.totalorder %s498_s15, 0 }
   0x9   : > { %p39_p3 = scmp.ne.s32.totalorder %s490_s13, %s486_s12  ;;  %p40_p4 = scmp.eq.s32.totalorder %s545_s16, 0 }
   0xa   : > { %s561_s21 = scalar_select %p24_p1, %s494_s14, %s26_s19  }
   0xb   : > { %p563_p5 = por %p34_p2, %p33_p0  ;;  %p567_p6 = por %p40_p4, %p39_p3 }
   0xc   : > { %p105_p7 = scmp.eq.s32.totalorder %s545_s16, 1  ;;  %p111_p8 = scmp.eq.s32.totalorder %s336_s17, 1 }
   0xd   : > { %s690_s23 = scalar_select %p567_p6, 1, 0 }
   0xe   : > { %p364_p10 = scmp.lt.s32.totalorder %s498_s15, 2  ;;  %p574_p11 = por %p105_p7, %p33_p0 }
   0xf   : > { %p578_p12 = por %p111_p8, %p39_p3  ;;  %s137_s26 = sand.u32 1, %s494_s14  }
  0x10   : > { %s691_s24 = scalar_select %p574_p11, 1, 0 }
  0x11   : > { %s692_s25 = scalar_select %p578_p12, 1, 0 }
  0x12   : > { %s350_s27 = sshll.u32 %s498_s15, 7  ;;  %s339_s28 = sshll.u32 %s137_s26, 3 }
  0x13   : > { %s587_s4 = scalar_lea.hbm %s683_s0, %s350_s27  ;;  %s141_s5 = scalar_lea.vmem [#allocation2], %s339_s28 }
  0x14   : > { %s149_s6 = sshll.u32 %s141_s5, 4  ;;  %p591_p13 = pnand %p364_p10, %p563_p5  ;;  %s595_s6 = int_to_ptr.vmem [resolvable:$true] %s149_s6 }
  0x15   : > { %s138_s8 = scalar_lea.sflag [#allocation3], %s137_s26  ;;  %s406_s9 = scalar_lea.hbm %s587_s4, 128 }
  0x16   : > { %p407_p2 = scmp.ne.s32.totalorder %s587_s4, %s406_s9  ;;  %p408_p3 = pneg %p591_p13 }
  0x17   : > { %s411_s17 = scalar_lea.hbm %s683_s0, 256  ;;  %p412_p5 = scmp.lt.s32.totalorder %s587_s4, %s683_s0 }
  0x18   : > { %p409_p4 = pnand %p408_p3, %p407_p2  ;;  %p413_p8 = scmp.lt.s32.totalorder %s411_s17, %s406_s9 }
  0x1a   : > { %p410_p7 = pneg %p409_p4  ;;  %p414_p10 = por %p413_p8, %p412_p5 }
  0x1c   : > { %p415_p9 = pnand %p414_p10, %p410_p7 }
  0x1e   : > { %418 = shalt.err (!%p415_p9)
}
  0x1f   : > { %s419_s22 = scalar_lea.vmem %s595_s6, 128  ;;  %s500_s26 = smov [#allocation2]  }
  0x20   : > { %p420_p0 = scmp.ne.s32.totalorder %s595_s6, %s419_s22  ;;  %s424_s27 = sshll.u32 %s500_s26, 4  ;;  %s425_s27 = int_to_ptr.vmem [resolvable:$false] %s424_s27 }
  0x21   : > { %s426_s28 = scalar_lea.vmem %s425_s27, 256  ;;  %p427_p4 = scmp.lt.s32.totalorder %s595_s6, %s425_s27 }
  0x22   : > { %p422_p1 = pnand %p420_p0, %p408_p3  ;;  %p428_p12 = scmp.lt.s32.totalorder %s426_s28, %s419_s22 }
  0x24   : > { %p423_p2 = pneg %p422_p1  ;;  %p429_p11 = por %p428_p12, %p427_p4 }
  0x26   : > { %p430_p6 = pnand %p429_p11, %p423_p2 }
  0x28   : > { %433 = shalt.err (!%p430_p6)
}
  0x29   : > { %359 = dma.hbm_to_vmem [thread:$0]  (!%p591_p13), %s587_s4, 128, %s595_s6, %s138_s8  }
  0x2a   : > { %p694_p9 = scmp.lt.s32.totalorder %s498_s15, 3  ;;  %p695_p7 = scmp.ge.s32.totalorder %s498_s15, 1 }
  0x2c   : > { %p155_p0 = pnand %p695_p7, %p694_p9 }
  0x2d   : > { %s622_s29 = sand.u32 (!%p155_p0), 1, %s490_s13   ;;  %p696_p6 = scmp.ne.s32.totalorder (!%p155_p0), %s690_s23, 0 }
  0x2e   : > { %158 = sbr.rel (%p155_p0) target bundleno = 400 (0x190), region = 32  ;;  %s343_s30 = sshll.u32 (!%p155_p0), %s622_s29, 3 }
  0x2f   : > { %s161_s5 = scalar_lea.sflag (!%p155_p0), [#allocation3], %s622_s29  ;;  %s628_s7 = scalar_lea.vmem (!%p155_p0), [#allocation2], %s343_s30 }
  0x33   : > { %477 = dma.done.wait (%p696_p6), %s161_s5, 128  }
  0x34   : > { %479 = vsyncadd (%p696_p6), %s161_s5, 4294967168  ;;  %v187_v0 = vld [vmem:[%s628_s7] sm:$0xf]  ;;  %vm189_vm0 = vcmask 1043456   ;;  %v194_v1 = vld [vmem:[%s628_s7 + $0x4] sm:$0xf]  ;;  %v231_v32 = vlaneseq }
  0x35   : > { %v188_v2 = vmul.f32 %v187_v0, %v187_v0  ;;  %v195_v3 = vmul.f32 %v194_v1, %v194_v1  ;;  %v501_v6 = vmov 0   ;;  %v219_v25 = vld [vmem:[%s684_s1] sm:$0xf]  ;;  %v502_v30 = vmov 839922192   ;;  %s351_s9 = sshll.u32 %s545_s16, 7 }
  0x36   : > { %400 = vset.pattern.permute.xlu1 %v501_v6  ;;  %401 = vset.pattern.permute.xlu0 %v501_v6  ;;  %v222_v29 = vld [vmem:[%s685_s2] sm:$0xf]  ;;  %v229_v31 = vunpack.c.l.s4 %v502_v30  ;;  %v232_v34 = vshrl.u32 %v231_v32, 7  ;;  %s186_s10 = scalar_lea.vmem [#allocation5], %s343_s30  ;;  %s264_s20 = scalar_lea.hbm %s686_s3, %s351_s9 }
  0x37   : > { %v190_v4 = vsel %vm189_vm0, %v188_v2, 0.0  ;;  %v196_v5 = vsel %vm189_vm0, %v195_v3, 0.0  ;;  %v223_v38 = vld [vmem:[%s628_s7] sm:$0xff]  ;;  %s266_s11 = sshll.u32 %s186_s10, 4  ;;  %s252_s22 = scalar_lea.sflag [#allocation4], %s622_s29  ;;  %s267_s11 = int_to_ptr.vmem [resolvable:$true] %s266_s11 }
  0x38   : > { %191 = vadd.xlane.f32.xlu0 %v190_v4  ;;  %v230_v33 = vunpack.c.0.s8 %v229_v31  ;;  %s434_s26 = scalar_lea.vmem %s267_s11, 128  ;;  %p697_p12 = scmp.ne.s32.totalorder %s691_s24, 0 }
  0x39   : > { %p435_p11 = scmp.ne.s32.totalorder %s267_s11, %s434_s26  ;;  %s503_s27 = smov [#allocation5]  }
  0x3a   : > { %v233_v35 = vsub.s32 %v230_v33, %v232_v34  ;;  %s438_s16 = sshll.u32 %s503_s27, 4  ;;  %s439_s16 = int_to_ptr.vmem [resolvable:$false] %s438_s16 }
  0x3b   : > { %p436_p13 = pnand %p435_p11, %p697_p12  ;;  %s440_s28 = scalar_lea.vmem %s439_s16, 256 }
  0x3c   : > { %197 = vadd.xlane.f32.xlu0 %v196_v5  ;;  %p441_p3 = scmp.lt.s32.totalorder %s267_s11, %s439_s16  ;;  %p442_p5 = scmp.lt.s32.totalorder %s440_s28, %s434_s26 }
  0x3d   : > { %p437_p1 = pneg %p436_p13 }
  0x3e   : > { %p443_p8 = por %p442_p5, %p441_p3 }
  0x40   : > { %p444_p10 = pnand %p443_p8, %p437_p1 }
  0xc1   : > { %v192_v7 = vpop.xlane.xlu0 %191 }
  0xc5   : > { %v198_v8 = vpop.xlane.xlu0 %197 }
  0xc6   : > { %v199_v9 = vadd.f32 %v198_v8, %v192_v7 }
  0xc8   : > { %402 = vrsqrt.f32 %v199_v9  ;;  %vm202_vm1 = vcmp.eq.f32.partialorder %v199_v9, inf  ;;  %v205_v12 = vand.u32 2147483648, %v199_v9  ;;  %vm204_vm2 = vcmp.eq.f32.partialorder %v199_v9, 0.0 }
  0xd5   : > { %v403_v10 = vpop.eup %402 }
  0xd6   : > { %v201_v11 = vmul.f32 %v403_v10, %v199_v9 }
  0xd8   : > { %v203_v13 = vsel %vm202_vm1, %v199_v9, %v201_v11 }
  0xd9   : > { %v206_v14 = vsel %vm204_vm2, %v205_v12, %v203_v13 }
  0xda   : > { %v207_v15 = vsel %vm189_vm0, %v206_v14, 0.0 }
  0xdb   : > { %v208_v16 = vrot.slane %v207_v15, 4 }
  0xdd   : > { %v209_v17 = vadd.f32 %v208_v16, %v207_v15 }
  0xdf   : > { %v210_v18 = vrot.slane %v209_v17, 2 }
  0xe1   : > { %v211_v19 = vadd.f32 %v210_v18, %v209_v17 }
  0xe3   : > { %v212_v20 = vrot.slane %v211_v19, 1 }
  0xe5   : > { %v213_v21 = vadd.f32 %v212_v20, %v211_v19 }
  0xe7   : > { %v215_v22 = vmul.f32 0.25, %v213_v21 }
  0xe9   : > { %v216_v23 = vadd.f32 1e-06, %v215_v22 }
  0xeb   : > { %404 = vrcp.f32 %v216_v23 }
  0xf8   : > { %v405_v24 = vpop.eup %404 }
  0xf9   : > { %v218_v26 = vmul.f32 %v405_v24, %v206_v14 }
  0xfb   : > { %v220_v27 = vmul.f32 %v219_v25, %v218_v26 }
  0xfd   : > { %v221_v28 = vadd.f32 1.0, %v220_v27 }
  0xff   : > { %226 = vperm.xlu1 %400, %v221_v28  }
 0x103   : > { %239 = vperm.xlu1 %400, %v222_v29  }
 0x17a   : > { %v227_v36 = vpop.permute.xlu1 %226 }
 0x17b   : > { %v234_v37 = vrot.slane %v227_v36, %v233_v35 }
 0x17d   : > { %v236_v40 = vmul.f32 %v234_v37, %v223_v38 }
 0x17e   : > { %v240_v39 = vpop.permute.xlu1 %239 }
 0x17f   : > { %v247_v41 = vrot.slane %v240_v39, %v233_v35 }
 0x181   : > { %v249_v42 = vadd.f32 %v247_v41, %v236_v40 }
 0x183   : > { %250 = vst [vmem:[%s186_s10] sm:$0xff] %v249_v42 }
 0x184   : > { %447 = shalt.err (!%p444_p10)
}
 0x185   : > { %s448_s30 = scalar_lea.hbm %s264_s20, 128  ;;  %s452_s7 = scalar_lea.hbm %s686_s3, 256 }
 0x186   : > { %p449_p2 = scmp.ne.s32.totalorder %s264_s20, %s448_s30  ;;  %p453_p7 = scmp.lt.s32.totalorder %s264_s20, %s686_s3 }
 0x187   : > { %p454_p0 = scmp.lt.s32.totalorder %s452_s7, %s448_s30 }
 0x188   : > { %p450_p4 = pnand %p449_p2, %p697_p12 }
 0x189   : > { %p455_p6 = por %p454_p0, %p453_p7 }
 0x18a   : > { %p451_p9 = pneg %p450_p4 }
 0x18c   : > { %p456_p11 = pnand %p455_p6, %p451_p9 }
 0x18e   : > { %459 = shalt.err (!%p456_p11)
}
 0x18f   : > { %354 = dma.vmem_to_hbm [thread:$0]  (%p697_p12), %s267_s11, 128, %s264_s20, %s252_s22  }
 0x190 PF: > { %s278_s6 = sand.u32 1, %s486_s12   ;;  %p698_p13 = scmp.ne.s32.totalorder %s692_s25, 0 }
 0x191   : > { %p699_p1 = scmp.ge.s32.totalorder %s498_s15, 2  ;;  %s279_s8 = scalar_lea.sflag [#allocation4], %s278_s6 }
 0x193   : > { %p361_p3 = pnand %p699_p1, %p698_p13 }
 0x195   : > { %p362_p5 = pneg %p361_p3 }
 0x197   : > { %481 = dma.done.wait (%p362_p5), %s279_s8, 128  }
 0x198   : > { %483 = vsyncadd (%p362_p5), %s279_s8, 4294967168  ;;  %p16_p8 = scmp.ge.s32.totalorder %s549_s18, 4   ;;  %s700_s12 = smov %s490_s13 }
 0x199   : > { %s701_s13 = smov %s494_s14  ;;  %s702_s14 = smov %s561_s21 }
 0x19a   : > { %s703_s15 = smov %s549_s18  ;;  %18 = sbr.rel (!%p16_p8) target bundleno = 5 (0x5), region = 77 }
 0x19f   :  { %284 = vsyncpa [#allocation3], 1 }
 0x1a0   :  { %286 = vsyncpa [#allocation3 + $0x1], 1 }
 0x1a1   :  { %287 = vsyncpa [#allocation4], 1 }
 0x1a2   :  { %289 = vsyncpa [#allocation4 + $0x1], 1 }

</bundles_post_ra>
